<compile_context>
chip_gen: v7x
topology: tpu7x:2x2x1
jax: 0.10.0
libtpu: 0.0.40
codegen_flags: <defaults>
</compile_context>

<pallas_src>
import jax
import jax.numpy as jnp
from jax.experimental import pallas as pl
from jax.experimental.pallas import tpu as pltpu


def _deepsets_kernel(idx_ref, table_ref, wphi_ref, bphi_ref, wrho_ref, brho_ref,
                     out_ref):
    """One batch tile per grid step.

    idx_ref   : (m, 1) int32,  m = Bt*2*S flattened (batch, team, set) indices
    table_ref : (nembed, D)    bf16 embedding table
    wphi_ref  : (D, H) bf16, bphi_ref : (1, H) f32
    wrho_ref  : (H, H) bf16, brho_ref : (1, H) f32
    out_ref   : (Bt*2, H) f32  -- relu(rho(...)) set features, row = (batch, team)
    """
    m = idx_ref.shape[0]
    rows = out_ref.shape[0]          # Bt * 2
    s = m // rows                    # set size S
    nembed = table_ref.shape[0]
    h_dim = wphi_ref.shape[1]

    # ---- embedding gather on the MXU: one-hot(idx) @ table -----------------
    idx = idx_ref[...]                                             # (m, 1)
    iota = jax.lax.broadcasted_iota(jnp.int32, (m, nembed), 1)
    onehot = (iota == idx).astype(table_ref.dtype)                 # (m, nembed) bf16
    emb = jnp.dot(onehot, table_ref[...],
                  preferred_element_type=jnp.float32)              # (m, D) f32

    # ---- phi: one fused matmul for both teams and all set elements ---------
    h = jnp.dot(emb.astype(wphi_ref.dtype), wphi_ref[...],
                preferred_element_type=jnp.float32)
    h = jnp.maximum(h + bphi_ref[...], 0.0)                        # (m, H)

    # ---- permutation-invariant sum pooling over the set axis ---------------
    pooled = jnp.sum(h.reshape(rows, s, h_dim), axis=1)            # (Bt*2, H)

    # ---- rho + outer ReLU (relu(set_embed1(...)) in the reference) ---------
    r = jnp.dot(pooled.astype(wrho_ref.dtype), wrho_ref[...],
                preferred_element_type=jnp.float32) + brho_ref[...]
    out_ref[...] = jnp.maximum(r, 0.0).astype(out_ref.dtype)


def _choose_batch_tile(batch, set_size, max_rows=4096):
    """Largest batch tile dividing `batch` whose row count keeps VMEM modest
    and whose block shapes satisfy the (8, 128) sublane rule (or equal full)."""
    bt = max(1, min(batch, max_rows // max(1, 2 * set_size)))
    while bt > 1:
        ok = (bt == batch) or (batch % bt == 0 and (2 * bt) % 8 == 0)
        if ok:
            break
        bt -= 1
    return bt


def baseline_embed_deepsets(x, params, *, batch_tile=None, mxu_dtype=jnp.bfloat16):
    """x: (B, 2, S) int32 indices. Returns (B, num_classes) f32 logits."""
    B, two, S = x.shape
    assert two == 2
    nembed, D = params["embed"].shape
    H = params["w_phi"].shape[1]

    Bt = _choose_batch_tile(B, S) if batch_tile is None else batch_tile
    assert B % Bt == 0
    grid = (B // Bt,)
    m_tile = Bt * 2 * S

    # Contiguous flattened indices, ordered (batch, team, set) -> row.
    idx = x.reshape(B * 2 * S, 1).astype(jnp.int32)

    # bf16 MXU operands; biases stay f32 (added to the f32 accumulators).
    table = params["embed"].astype(mxu_dtype)
    w_phi = params["w_phi"].astype(mxu_dtype)
    w_rho = params["w_rho"].astype(mxu_dtype)
    b_phi = params["b_phi"].astype(jnp.float32)
    b_rho = params["b_rho"].astype(jnp.float32)

    sets = pl.pallas_call(
        _deepsets_kernel,
        out_shape=jax.ShapeDtypeStruct((B * 2, H), jnp.float32),
        grid=grid,
        in_specs=[
            pl.BlockSpec((m_tile, 1), lambda i: (i, 0)),     # indices (per-tile)
            pl.BlockSpec((nembed, D), lambda i: (0, 0)),     # embedding table
            pl.BlockSpec((D, H), lambda i: (0, 0)),          # w_phi
            pl.BlockSpec((1, H), lambda i: (0, 0)),          # b_phi
            pl.BlockSpec((H, H), lambda i: (0, 0)),          # w_rho
            pl.BlockSpec((1, H), lambda i: (0, 0)),          # b_rho
        ],
        out_specs=pl.BlockSpec((Bt * 2, H), lambda i: (i, 0)),
        compiler_params=pltpu.CompilerParams(
            dimension_semantics=("parallel",),               # megacore on v7x
            vmem_limit_bytes=32 * 1024 * 1024,
        ),
    )(idx, table, w_phi, b_phi, w_rho, b_rho)

    # hstack([set1, set2]) per batch element == reshape (B, 2, H) -> (B, 2H).
    sets = sets.reshape(B, 2 * H)
    # Tiny fc_out (2H -> num_classes) stays in XLA: keeps the kernel output
    # lane-dense and costs nothing.
    return sets @ params["w_out"] + params["b_out"]


def init_params(key, nembed, embed_dim, hid_dim, num_classes=2):
    ks = jax.random.split(key, 7)
    scale = 0.1
    return {
        "embed": scale * jax.random.normal(ks[0], (nembed, embed_dim), jnp.float32),
        # DeepSets (set_embed1) -- phi: Linear(embed_dim, hid), rho: Linear(hid, hid)
        "w_phi": scale * jax.random.normal(ks[1], (embed_dim, hid_dim), jnp.float32),
        "b_phi": scale * jax.random.normal(ks[2], (1, hid_dim), jnp.float32),
        "w_rho": scale * jax.random.normal(ks[3], (hid_dim, hid_dim), jnp.float32),
        "b_rho": scale * jax.random.normal(ks[4], (1, hid_dim), jnp.float32),
        # fc_out: Linear(2*hid, num_classes), stored (in, out)
        "w_out": scale * jax.random.normal(ks[5], (2 * hid_dim, num_classes), jnp.float32),
        "b_out": scale * jax.random.normal(ks[6], (1, num_classes), jnp.float32),
    }


def reference_forward(x, params):
    """Pure-JAX f32 reference mirroring the PyTorch forward."""
    emb = params["embed"][x]                 # (B, 2, S, D)

    def deepsets(e):
        h = jnp.maximum(e @ params["w_phi"] + params["b_phi"][None], 0.0)
        pooled = h.sum(axis=1)
        return pooled @ params["w_rho"] + params["b_rho"]

    s1 = jnp.maximum(deepsets(emb[:, 0]), 0.0)
    s2 = jnp.maximum(deepsets(emb[:, 1]), 0.0)   # same weights (set_embed1), as in reference
    sets = jnp.concatenate([s1, s2], axis=-1)
    return sets @ params["w_out"] + params["b_out"]


if __name__ == "__main__":
    key = jax.random.PRNGKey(0)
    k_param, k_x = jax.random.split(key)

    # Small, module-consistent shapes: batch=4, 2 teams, 8 set elements,
    # vocabulary 64, embed_dim=32, hid_dim=32, num_classes=2.
    B, S = 4, 8
    NEMBED, EMBED_DIM, HID_DIM, NUM_CLASSES = 64, 32, 32, 2

    params = init_params(k_param, NEMBED, EMBED_DIM, HID_DIM, NUM_CLASSES)
    x = jax.random.randint(k_x, (B, 2, S), minval=0, maxval=NEMBED, dtype=jnp.int32)

    out = jax.block_until_ready(baseline_embed_deepsets(x, params))
    ref = reference_forward(x, params)

    assert out.shape == (B, NUM_CLASSES)
    # bf16 MXU operands with f32 accumulation -> loosened tolerance vs f32 reference.
    assert jnp.allclose(out, ref, atol=2e-2, rtol=2e-2), (out, ref)

    print("KERNEL_OK")
</pallas_src>

<mosaic_0001>
module attributes {stable_mosaic.version = 11 : i64} {
  func.func @_deepsets_kernel(%arg0: i32, %arg1: memref<64x1xi32, #tpu.memory_space<vmem>>, %arg2: memref<64x32xbf16, #tpu.memory_space<vmem>>, %arg3: memref<32x32xbf16, #tpu.memory_space<vmem>>, %arg4: memref<1x32xf32, #tpu.memory_space<vmem>>, %arg5: memref<32x32xbf16, #tpu.memory_space<vmem>>, %arg6: memref<1x32xf32, #tpu.memory_space<vmem>>, %arg7: memref<8x32xf32, #tpu.memory_space<vmem>>) attributes {dimension_semantics = [#tpu.dimension_semantics<parallel>], iteration_bounds = array<i64: 1>, scalar_prefetch = 0 : i64, scratch_operands = 0 : i64, tpu.core_type = #tpu.core_type<tc>, window_params = [{transform_indices = @transform_0, window_bounds = array<i64: 64, 1>}, {pipeline_mode = #tpu.pipeline_mode<synchronous>, transform_indices = @transform_1, window_bounds = array<i64: 64, 32>}, {pipeline_mode = #tpu.pipeline_mode<synchronous>, transform_indices = @transform_2, window_bounds = array<i64: 32, 32>}, {pipeline_mode = #tpu.pipeline_mode<synchronous>, transform_indices = @transform_3, window_bounds = array<i64: 1, 32>}, {pipeline_mode = #tpu.pipeline_mode<synchronous>, transform_indices = @transform_4, window_bounds = array<i64: 32, 32>}, {pipeline_mode = #tpu.pipeline_mode<synchronous>, transform_indices = @transform_5, window_bounds = array<i64: 1, 32>}, {transform_indices = @transform_6, window_bounds = array<i64: 8, 32>}]} {
    %c0 = arith.constant 0 : index
    %c0_0 = arith.constant 0 : index
    %0 = vector.load %arg1[%c0, %c0_0] : memref<64x1xi32, #tpu.memory_space<vmem>>, vector<64x1xi32>
    %1 = tpu.iota {dimensions = array<i32: 1>} : vector<64x64xi32>
    %2 = vector.broadcast %0 : vector<64x1xi32> to vector<64x64xi32>
    %3 = arith.cmpi eq, %1, %2 : vector<64x64xi32>
    %4 = arith.extui %3 : vector<64x64xi1> to vector<64x64xi32>
    %5 = arith.sitofp %4 : vector<64x64xi32> to vector<64x64xf32>
    %6 = arith.truncf %5 : vector<64x64xf32> to vector<64x64xbf16>
    %c0_1 = arith.constant 0 : index
    %c0_2 = arith.constant 0 : index
    %7 = vector.load %arg2[%c0_1, %c0_2] : memref<64x32xbf16, #tpu.memory_space<vmem>>, vector<64x32xbf16>
    %cst = arith.constant dense<0.000000e+00> : vector<64x32xf32>
    %8 = tpu.matmul %6, %7, %cst {dimension_numbers = #tpu.dot_dimension_numbers<[1], [0], [0], [1], [0, 0, 1, 1], [], []>} : vector<64x64xbf16>, vector<64x32xbf16>, vector<64x32xf32> -> vector<64x32xf32>
    %9 = arith.truncf %8 : vector<64x32xf32> to vector<64x32xbf16>
    %c0_3 = arith.constant 0 : index
    %c0_4 = arith.constant 0 : index
    %10 = vector.load %arg3[%c0_3, %c0_4] : memref<32x32xbf16, #tpu.memory_space<vmem>>, vector<32x32xbf16>
    %cst_5 = arith.constant dense<0.000000e+00> : vector<64x32xf32>
    %11 = tpu.matmul %9, %10, %cst_5 {dimension_numbers = #tpu.dot_dimension_numbers<[1], [0], [0], [1], [0, 0, 1, 1], [], []>} : vector<64x32xbf16>, vector<32x32xbf16>, vector<64x32xf32> -> vector<64x32xf32>
    %c0_6 = arith.constant 0 : index
    %c0_7 = arith.constant 0 : index
    %12 = vector.load %arg4[%c0_6, %c0_7] : memref<1x32xf32, #tpu.memory_space<vmem>>, vector<1x32xf32>
    %13 = vector.broadcast %12 : vector<1x32xf32> to vector<64x32xf32>
    %14 = arith.addf %11, %13 : vector<64x32xf32>
    %cst_8 = arith.constant 0.000000e+00 : f32
    %15 = vector.broadcast %cst_8 : f32 to vector<64x32xf32>
    %16 = arith.maximumf %14, %15 : vector<64x32xf32>
    %17 = vector.shape_cast %16 : vector<64x32xf32> to vector<8x8x32xf32>
    %cst_9 = arith.constant dense<0.000000e+00> : vector<8x32xf32>
    %18 = vector.multi_reduction <add>, %17, %cst_9 [1] : vector<8x8x32xf32> to vector<8x32xf32>
    %19 = arith.truncf %18 : vector<8x32xf32> to vector<8x32xbf16>
    %c0_10 = arith.constant 0 : index
    %c0_11 = arith.constant 0 : index
    %20 = vector.load %arg5[%c0_10, %c0_11] : memref<32x32xbf16, #tpu.memory_space<vmem>>, vector<32x32xbf16>
    %cst_12 = arith.constant dense<0.000000e+00> : vector<8x32xf32>
    %21 = tpu.matmul %19, %20, %cst_12 {dimension_numbers = #tpu.dot_dimension_numbers<[1], [0], [0], [1], [0, 0, 1, 1], [], []>} : vector<8x32xbf16>, vector<32x32xbf16>, vector<8x32xf32> -> vector<8x32xf32>
    %c0_13 = arith.constant 0 : index
    %c0_14 = arith.constant 0 : index
    %22 = vector.load %arg6[%c0_13, %c0_14] : memref<1x32xf32, #tpu.memory_space<vmem>>, vector<1x32xf32>
    %23 = vector.broadcast %22 : vector<1x32xf32> to vector<8x32xf32>
    %24 = arith.addf %21, %23 : vector<8x32xf32>
    %cst_15 = arith.constant 0.000000e+00 : f32
    %25 = vector.broadcast %cst_15 : f32 to vector<8x32xf32>
    %26 = arith.maximumf %24, %25 : vector<8x32xf32>
    %c0_16 = arith.constant 0 : index
    %c0_17 = arith.constant 0 : index
    %27 = vector.load %arg7[%c0_16, %c0_17] : memref<8x32xf32, #tpu.memory_space<vmem>>, vector<8x32xf32>
    tpu.vector_store %arg7[%c0_16, %c0_17], %26 {strides = array<i32>} : memref<8x32xf32, #tpu.memory_space<vmem>>, vector<8x32xf32>,
    return
  }
  func.func @transform_0(%arg0: i32) -> (i32, i32) {
    %c0_i32 = arith.constant 0 : i32
    %c0_i32_0 = arith.constant 0 : i32
    return %arg0, %c0_i32 : i32, i32
  }
  func.func @transform_1(%arg0: i32) -> (i32, i32) {
    %c0_i32 = arith.constant 0 : i32
    %c0_i32_0 = arith.constant 0 : i32
    %c0_i32_1 = arith.constant 0 : i32
    return %c0_i32, %c0_i32_0 : i32, i32
  }
  func.func @transform_2(%arg0: i32) -> (i32, i32) {
    %c0_i32 = arith.constant 0 : i32
    %c0_i32_0 = arith.constant 0 : i32
    %c0_i32_1 = arith.constant 0 : i32
    return %c0_i32, %c0_i32_0 : i32, i32
  }
  func.func @transform_3(%arg0: i32) -> (i32, i32) {
    %c0_i32 = arith.constant 0 : i32
    %c0_i32_0 = arith.constant 0 : i32
    %c0_i32_1 = arith.constant 0 : i32
    return %c0_i32, %c0_i32_0 : i32, i32
  }
  func.func @transform_4(%arg0: i32) -> (i32, i32) {
    %c0_i32 = arith.constant 0 : i32
    %c0_i32_0 = arith.constant 0 : i32
    %c0_i32_1 = arith.constant 0 : i32
    return %c0_i32, %c0_i32_0 : i32, i32
  }
  func.func @transform_5(%arg0: i32) -> (i32, i32) {
    %c0_i32 = arith.constant 0 : i32
    %c0_i32_0 = arith.constant 0 : i32
    %c0_i32_1 = arith.constant 0 : i32
    return %c0_i32, %c0_i32_0 : i32, i32
  }
  func.func @transform_6(%arg0: i32) -> (i32, i32) {
    %c0_i32 = arith.constant 0 : i32
    %c0_i32_0 = arith.constant 0 : i32
    return %arg0, %c0_i32 : i32, i32
  }
}

</mosaic_0001>

<bundles_post_ra>
// kernel: tpu_custom_call.1
= control target key start
LH: loop header
LB: loop body
LE: loop exit
PB: predicated region body
PF: predicated region fallthrough
CT: control target
= control target key end

     0   :  { %v605_v2 = vmov 0   ;;  %s728_s0 = inlined_call_operand.vmem [shape: s32[64,1], index: 0, kind: input, shape index: {}]   ;;  %s729_s1 = inlined_call_operand.vmem [shape: bf16[64,32], index: 1, kind: input, shape index: {}]   ;;  %s730_s2 = inlined_call_operand.vmem [shape: bf16[32,32], index: 2, kind: input, shape index: {}]   ;;  %s731_s3 = inlined_call_operand.vmem [shape: f32[1,32], index: 3, kind: input, shape index: {}]   ;;  %s732_s4 = inlined_call_operand.vmem [shape: bf16[32,32], index: 4, kind: input, shape index: {}]   ;;  %s733_s5 = inlined_call_operand.vmem [shape: f32[1,32], index: 5, kind: input, shape index: {}]   ;;  %s734_s6 = inlined_call_operand.hbm [shape: f32[8,32], index: 6, kind: output, shape index: {}]  }
   0x1   :  { %v27_v0 = vld [vmem:[%s728_s0 + $0x10] sm:$0xff]  ;;  %v25_v1 = vld [vmem:[%s728_s0] sm:$0xff]  ;;  %572 = vset.pattern.permute.xlu1 %v605_v2  ;;  %571 = vset.pattern.permute.xlu0 %v605_v2  ;;  %v28_v3 = vld [vmem:[%s728_s0 + $0x18] sm:$0xff] }
   0x2   :  { %42 = vperm.xlu1 %572, %v27_v0   ;;  %36 = vperm.xlu0 %571, %v25_v1   ;;  %v26_v4 = vld [vmem:[%s728_s0 + $0x8] sm:$0xff]  ;;  %v573_v5 = vld [vmem:[%s729_s1] sm:$0xff]   ;;  %v575_v9 = vld [vmem:[%s729_s1 + $0x10] sm:$0xff]  }
   0x3   :  { %v574_v6 = vld [vmem:[%s729_s1 + $0x8] sm:$0xff]   ;;  %v29_v8 = vld [vmem:[%s728_s0 + $0x20] sm:$0xff]  ;;  %531 = vmatprep.subr.bf16.mxu0 %v573_v5 }
   0x4   :  { %v30_v7 = vld [vmem:[%s728_s0 + $0x28] sm:$0xff]  ;;  %532 = vmatpush3.bf16.msra.mxu0 %v573_v5 }
   0x5   :  { %533 = vmatprep.subr.bf16.mxu0 %v574_v6 }
   0x6   :  { %45 = vperm.xlu1 %572, %v28_v3   ;;  %39 = vperm.xlu0 %571, %v26_v4  }
   0x7   :  { %11 = vsyncpa [#allocation3], 0  ;;  %v32_v10 = vld [vmem:[%s728_s0 + $0x38] sm:$0xff]  ;;  %v31_v11 = vld [vmem:[%s728_s0 + $0x30] sm:$0xff]  ;;  %v33_v14 = vlaneseq  ;;  %vm119_vm4 = vcmask 523264   ;;  %v606_v20 = vmov 0.0  }
   0x8   :  { %534 = vmatpush3.bf16.msra.mxu0 %v574_v6  ;;  %v576_v12 = vld [vmem:[%s729_s1 + $0x18] sm:$0xff]   ;;  %v577_v13 = vld [vmem:[%s730_s2] sm:$0xff]   ;;  %v578_v37 = vld [vmem:[%s730_s2 + $0x8] sm:$0xff]   ;;  %vm224_vm9 = vcmask 261120   ;;  %vm607_vm10 = vmmov 0   ;;  %vm401_vm11 = vcmask 1041409  }
   0x9   :  { %535 = vmatprep.subr.bf16.mxu0 %v575_v9  ;;  %547 = vmatprep.subr.bf16.mxu1 %v577_v13  ;;  %v34_v15 = vand.u32 127, %v33_v14  ;;  %v579_v50 = vld [vmem:[%s732_s4] sm:$0xff]   ;;  %v580_v51 = vld [vmem:[%s732_s4 + $0x8] sm:$0xff]   ;;  %vm403_vm12 = vcmask 1042434   ;;  %vm405_vm13 = vcmask 1043459   ;;  %vm407_vm14 = vcmask 1044484  }
   0xa   :  { %51 = vperm.xlu1 %572, %v30_v7   ;;  %48 = vperm.xlu0 %571, %v29_v8   ;;  %v503_v52 = vld [vmem:[%s731_s3] ss:$0 sm:$0xff]  ;;  %vm409_vm15 = vcmask 1045509   ;;  %s608_s28 = smov [#allocation2]  }
   0xb   :  { %548 = vmatpush3.bf16.msra.mxu1 %v577_v13  ;;  %s479_s29 = sshll.u32 %s608_s28, 4  ;;  %s480_s29 = int_to_ptr.vmem [resolvable:$true] %s479_s29 }
   0xc   :  { %536 = vmatpush3.bf16.msra.mxu0 %v575_v9  ;;  %549 = vmatprep.subr.bf16.mxu1 %v578_v37  ;;  %s581_s30 = scalar_lea.vmem %s480_s29, 128  ;;  %p586_p1 = scmp.lt.s32.totalorder %s480_s29, %s480_s29 }
   0xd   :  { %537 = vmatprep.subr.bf16.mxu0 %v576_v12  ;;  %p582_p0 = scmp.ne.s32.totalorder %s480_s29, %s581_s30  ;;  %p587_p2 = scmp.lt.s32.totalorder %s581_s30, %s581_s30 }
   0xe   :  { %57 = vperm.xlu1 %572, %v32_v10   ;;  %54 = vperm.xlu0 %571, %v31_v11  }
   0xf   :  { %550 = vmatpush3.bf16.msra.mxu1 %v578_v37  ;;  %p588_p3 = por %p587_p2, %p586_p1 }
  0x10   :  { %538 = vmatpush3.bf16.msra.mxu0 %v576_v12  ;;  %559 = vmatprep.subr.bf16.mxu1 %v606_v20 }
  0x11   :  { %p589_p4 = pnand %p588_p3, %p582_p0 }
  0x81   :  { %v43_v16 = vpop.permute.xlu1 %42  ;;  %v37_v17 = vpop.permute.xlu0 %36 }
  0x82   :  { %vm61_vm0 = vcmp.eq.s32.totalorder %v34_v15, %v43_v16  ;;  %vm59_vm1 = vcmp.eq.s32.totalorder %v34_v15, %v37_v17 }
  0x83   :  { %v489_v21 = vsel %vm61_vm0, 1.0, %v606_v20  ;;  %v487_v22 = vsel %vm59_vm1, 1.0, %v606_v20  ;;  %vm411_vm0 = vcmask 1046534   ;;  %vm413_vm1 = vcmask 1047559  }
  0x85   :  { %v46_v18 = vpop.permute.xlu1 %45  ;;  %v40_v19 = vpop.permute.xlu0 %39 }
  0x86   :  { %vm62_vm2 = vcmp.eq.s32.totalorder %v34_v15, %v46_v18  ;;  %vm60_vm3 = vcmp.eq.s32.totalorder %v34_v15, %v40_v19 }
  0x87   :  { %v490_v23 = vsel %vm62_vm2, 1.0, %v606_v20  ;;  %v488_v24 = vsel %vm60_vm3, 1.0, %v606_v20 }
  0x88   :  { %v84_v25 = vpack.c.bf16 %v490_v23, %v489_v21  ;;  %v83_v26 = vpack.c.bf16 %v488_v24, %v487_v22 }
  0x89   :  { %v52_v27 = vpop.permute.xlu1 %51  ;;  %v49_v28 = vpop.permute.xlu0 %48 }
  0x8a   :  { %vm64_vm5 = vcmp.eq.s32.totalorder %v34_v15, %v52_v27  ;;  %vm63_vm6 = vcmp.eq.s32.totalorder %v34_v15, %v49_v28  ;;  %539 = vmatprep.mubr.msk.bf16.mxu0 %vm119_vm4, %v83_v26 }
  0x8b   :  { %v492_v29 = vsel %vm64_vm5, 1.0, %v606_v20  ;;  %v491_v30 = vsel %vm63_vm6, 1.0, %v606_v20  ;;  %540 = vmatmul.mubr.msk.bf16.vlgmr.msra.gmra.mrb[0].mxu0 %vm119_vm4, %v84_v25 }
  0x8c   :  { %v85_v31 = vpack.c.bf16 %v492_v29, %v491_v30 }
  0x8d   :  { %v58_v32 = vpop.permute.xlu1 %57  ;;  %v55_v33 = vpop.permute.xlu0 %54 }
  0x8e   :  { %vm66_vm7 = vcmp.eq.s32.totalorder %v34_v15, %v58_v32  ;;  %vm65_vm8 = vcmp.eq.s32.totalorder %v34_v15, %v55_v33  ;;  %543 = vmatprep.mubr.msk.bf16.mxu0 %vm119_vm4, %v85_v31 }
  0x8f   :  { %v494_v34 = vsel %vm66_vm7, 1.0, %v606_v20  ;;  %v493_v35 = vsel %vm65_vm8, 1.0, %v606_v20 }
  0x90   :  { %v86_v36 = vpack.c.bf16 %v494_v34, %v493_v35 }
  0x93   :  { %544 = vmatmul.mubr.msk.bf16.gmra.mrb[4].mxu0 %vm119_vm4, %v86_v36 }
 0x15e   :  { %v541_v38 = vpop.f32.mrb[0].mxu0 }
 0x15f   :  { %v166_v39 = vpop.f32.mrb[1].mxu0 }
 0x160   :  { %v542_v40 = vpop.f32.mrb[2].mxu0 }
 0x161   :  { %v198_v41 = vpack.c.bf16 %v542_v40, %v541_v38  ;;  %v169_v42 = vpop.f32.mrb[3].mxu0 }
 0x162   :  { %v197_v43 = vpack.c.bf16 %v169_v42, %v166_v39 }
 0x164   :  { %551 = vmatprep.mubr.msk.bf16.mxu1 %vm224_vm9, %v197_v43 }
 0x165   :  { %552 = vmatmul.mubr.msk.bf16.vlgmr.msra.gmra.mrb[0].mxu1 %vm224_vm9, %v198_v41 }
 0x166   :  { %v545_v44 = vpop.f32.mrb[4].mxu0  ;;  %560 = vmatpush3.bf16.msra.mxu1 %v579_v50 }
 0x167   :  { %v182_v45 = vpop.f32.mrb[5].mxu0  ;;  %561 = vmatprep.subr.bf16.mxu1 %v606_v20 }
 0x168   :  { %v546_v46 = vpop.f32.mrb[6].mxu0 }
 0x169   :  { %v200_v47 = vpack.c.bf16 %v546_v46, %v545_v44  ;;  %v185_v48 = vpop.f32.mrb[7].mxu0 }
 0x16a   :  { %v199_v49 = vpack.c.bf16 %v185_v48, %v182_v45  ;;  %562 = vmatpush3.bf16.msra.mxu1 %v580_v51 }
 0x16c   :  { %555 = vmatprep.mubr.msk.bf16.mxu1 %vm224_vm9, %v199_v49 }
 0x16d   :  { %556 = vmatmul.mubr.msk.bf16.gmra.mrb[4].mxu1 %vm224_vm9, %v200_v47 }
 0x16e   :  { %563 = vmatprep.mubr.msk.bf16.mxu1 %vm607_vm10, %v606_v20 }
 0x238   :  { %v553_v53 = vpop.f32.mrb[0].mxu1 }
 0x239   :  { %v280_v54 = vadd.f32 %v553_v53, %v503_v52  ;;  %v271_v55 = vpop.f32.mrb[1].mxu1 }
 0x23a   :  { %v272_v56 = vadd.f32 %v503_v52, %v271_v55  ;;  %v554_v57 = vpop.f32.mrb[2].mxu1 }
 0x23b   :  { %v304_v58 = vmax.f32 %v280_v54, 0.0  ;;  %v283_v59 = vadd.f32 %v554_v57, %v503_v52  ;;  %v274_v60 = vpop.f32.mrb[3].mxu1 }
 0x23c   :  { %v302_v61 = vmax.f32 %v272_v56, 0.0  ;;  %v275_v62 = vadd.f32 %v503_v52, %v274_v60 }
 0x23d   :  { %v324_v63 = vsel %vm224_vm9, %v304_v58, 0.0  ;;  %v305_v0 = vmax.f32 %v283_v59, 0.0 }
 0x23e   :  { %v325_v1 = vrot.slane %v324_v63, 4  ;;  %v310_v2 = vsel %vm224_vm9, %v302_v61, 0.0  ;;  %v303_v3 = vmax.f32 %v275_v62, 0.0 }
 0x23f   :  { %v311_v4 = vrot.slane %v310_v2, 4  ;;  %v331_v5 = vsel %vm224_vm9, %v305_v0, 0.0 }
 0x240   :  { %v326_v6 = vadd.f32 %v325_v1, %v324_v63  ;;  %v332_v7 = vrot.slane %v331_v5, 4  ;;  %v317_v8 = vsel %vm224_vm9, %v303_v3, 0.0  ;;  %v557_v9 = vpop.f32.mrb[4].mxu1 }
 0x241   :  { %v312_v10 = vadd.f32 %v311_v4, %v310_v2  ;;  %v318_v11 = vrot.slane %v317_v8, 4  ;;  %v296_v12 = vadd.f32 %v557_v9, %v503_v52  ;;  %v287_v13 = vpop.f32.mrb[5].mxu1 }
 0x242   :  { %v327_v14 = vrot.slane %v326_v6, 2  ;;  %v333_v15 = vadd.f32 %v332_v7, %v331_v5  ;;  %v288_v16 = vadd.f32 %v503_v52, %v287_v13  ;;  %v558_v17 = vpop.f32.mrb[6].mxu1 }
 0x243   :  { %v313_v18 = vrot.slane %v312_v10, 2  ;;  %v319_v19 = vadd.f32 %v318_v11, %v317_v8  ;;  %v308_v20 = vmax.f32 %v296_v12, 0.0  ;;  %v299_v21 = vadd.f32 %v558_v17, %v503_v52  ;;  %v290_v22 = vpop.f32.mrb[7].mxu1 }
 0x244   :  { %v328_v23 = vadd.f32 %v327_v14, %v326_v6  ;;  %v334_v24 = vrot.slane %v333_v15, 2  ;;  %v306_v25 = vmax.f32 %v288_v16, 0.0  ;;  %v291_v26 = vadd.f32 %v503_v52, %v290_v22 }
 0x245   :  { %v314_v27 = vadd.f32 %v313_v18, %v312_v10  ;;  %v320_v28 = vrot.slane %v319_v19, 2  ;;  %v352_v29 = vsel %vm224_vm9, %v308_v20, 0.0  ;;  %v309_v30 = vmax.f32 %v299_v21, 0.0 }
 0x246   :  { %v329_v31 = vrot.slane %v328_v23, 1  ;;  %v335_v32 = vadd.f32 %v334_v24, %v333_v15  ;;  %v353_v33 = vrot.slane %v352_v29, 4  ;;  %v338_v34 = vsel %vm224_vm9, %v306_v25, 0.0 }
 0x247   :  { %v315_v35 = vrot.slane %v314_v27, 1  ;;  %v321_v36 = vadd.f32 %v320_v28, %v319_v19  ;;  %v339_v37 = vrot.slane %v338_v34, 4  ;;  %v359_v38 = vsel %vm224_vm9, %v309_v30, 0.0 }
 0x248   :  { %v330_v39 = vadd.f32 %v329_v31, %v328_v23  ;;  %v336_v40 = vrot.slane %v335_v32, 1  ;;  %v354_v41 = vadd.f32 %v353_v33, %v352_v29  ;;  %v360_v42 = vrot.slane %v359_v38, 4  ;;  %v510_v29 = vld [vmem:[%s733_s5] ss:$0 sm:$0xff] }
 0x249   :  { %v316_v43 = vadd.f32 %v315_v35, %v314_v27  ;;  %v322_v44 = vrot.slane %v321_v36, 1  ;;  %v340_v45 = vadd.f32 %v339_v37, %v338_v34  ;;  %v307_v46 = vmax.f32 %v291_v26, 0.0 }
 0x24a   :  { %v337_v47 = vadd.f32 %v336_v40, %v335_v32  ;;  %v355_v48 = vrot.slane %v354_v41, 2  ;;  %v361_v49 = vadd.f32 %v360_v42, %v359_v38  ;;  %v368_v54 = vpack.c.bf16 %v330_v39, %v330_v39 }
 0x24b   :  { %v366_v50 = vpack.c.bf16 %v316_v43, %v316_v43  ;;  %v323_v51 = vadd.f32 %v322_v44, %v321_v36  ;;  %v341_v52 = vrot.slane %v340_v45, 2  ;;  %v345_v53 = vsel %vm224_vm9, %v307_v46, 0.0 }
 0x24c   :  { %v369_v55 = vpack.c.bf16 %v337_v47, %v337_v47  ;;  %v356_v56 = vadd.f32 %v355_v48, %v354_v41  ;;  %v362_v57 = vrot.slane %v361_v49, 2  ;;  %v346_v60 = vrot.slane %v345_v53, 4 }
 0x24d   :  { %v367_v58 = vpack.c.bf16 %v323_v51, %v323_v51  ;;  %v342_v59 = vadd.f32 %v341_v52, %v340_v45  ;;  %v393_v62 = vunpack.c.l.b16 %v366_v50  ;;  %v395_v2 = vunpack.c.l.b16 %v368_v54 }
 0x24e   :  { %v363_v61 = vadd.f32 %v362_v57, %v361_v49  ;;  %v347_v1 = vadd.f32 %v346_v60, %v345_v53  ;;  %v396_v3 = vunpack.c.l.b16 %v369_v55  ;;  %v357_v4 = vrot.slane %v356_v56, 1 }
 0x24f   :  { %v394_v63 = vunpack.c.l.b16 %v367_v58  ;;  %v343_v0 = vrot.slane %v342_v59, 1 }
 0x250   :  { %v364_v7 = vrot.slane %v363_v61, 1  ;;  %v348_v8 = vrot.slane %v347_v1, 2  ;;  %v358_v13 = vadd.f32 %v357_v4, %v356_v56 }
 0x251   :  { %v402_v5 = vsel %vm401_vm11, %v394_v63, %v393_v62  ;;  %v344_v6 = vadd.f32 %v343_v0, %v342_v59 }
 0x252   :  { %v404_v9 = vsel %vm403_vm12, %v395_v2, %v402_v5  ;;  %v349_v12 = vadd.f32 %v348_v8, %v347_v1  ;;  %v365_v15 = vadd.f32 %v364_v7, %v363_v61  ;;  %v372_v19 = vpack.c.bf16 %v358_v13, %v358_v13 }
 0x253   :  { %v370_v10 = vpack.c.bf16 %v344_v6, %v344_v6  ;;  %v406_v11 = vsel %vm405_vm13, %v396_v3, %v404_v9 }
 0x254   :  { %v350_v16 = vrot.slane %v349_v12, 1  ;;  %v373_v20 = vpack.c.bf16 %v365_v15, %v365_v15  ;;  %v399_v23 = vunpack.c.l.b16 %v372_v19 }
 0x255   :  { %v397_v14 = vunpack.c.l.b16 %v370_v10 }
 0x256   :  { %v351_v18 = vadd.f32 %v350_v16, %v349_v12  ;;  %v400_v24 = vunpack.c.l.b16 %v373_v20 }
 0x257   :  { %v408_v17 = vsel %vm407_vm14, %v397_v14, %v406_v11 }
 0x258   :  { %v371_v21 = vpack.c.bf16 %v351_v18, %v351_v18 }
 0x25a   :  { %v398_v22 = vunpack.c.l.b16 %v371_v21 }
 0x25c   :  { %v410_v25 = vsel %vm409_vm15, %v398_v22, %v408_v17 }
 0x25d   :  { %v412_v26 = vsel %vm411_vm0, %v399_v23, %v410_v25 }
 0x25e   :  { %v414_v27 = vsel %vm413_vm1, %v400_v24, %v412_v26 }
 0x25f   :  { %v415_v28 = vpack.c.b16 %v414_v27, %v414_v27 }
 0x261   :  { %564 = vmatmul.mubr.msk.bf16.vlgmr.msra.gmra.mrb[8].mxu1 %vm224_vm9, %v415_v28 }
 0x334   :  { %v465_v30 = vpop.f32.mrb[8].mxu1 }
 0x335   :  { %v466_v31 = vadd.f32 %v510_v29, %v465_v30  ;;  %v565_v32 = vpop.f32.mrb[9].mxu1 }
 0x336   :  { %v468_v33 = vpop.f32.mrb[10].mxu1 }
 0x337   :  { %v471_v34 = vmax.f32 %v466_v31, 0.0  ;;  %v566_v35 = vpop.f32.mrb[11].mxu1 }
 0x339   :  { %472 = vst.msk [vmem:[#allocation2] sm:$0xff] %vm224_vm9, %v471_v34 }
 0x33a   :  { %592 = shalt.err (!%p589_p4)
}
 0x33b   :  { %s593_s8 = scalar_lea.hbm %s734_s6, 128 }
 0x33c   :  { %p594_p5 = scmp.ne.s32.totalorder %s734_s6, %s593_s8  ;;  %p597_p6 = scmp.lt.u32.totalorder %s593_s8, %s734_s6 }
 0x33e   :  { %p599_p7 = pnand %p597_p6, %p594_p5 }
 0x340   :  { %602 = shalt.err (!%p599_p7)
}
 0x341   :  { %482 = dma.vmem_to_hbm [thread:$0]  %s480_s29, 128, %s734_s6, [#allocation3]  }
 0x342   :  { %603 = dma.done.wait [#allocation3], 128  }
 0x343   :  { %604 = vsyncadd [#allocation3], 4294967168 }
 0x344   :  { %486 = vsyncpa [#allocation3], 1 }

</bundles_post_ra>
